<compile_context>
chip_gen: v7x
topology: tpu7x:2x2x1
jax: 0.10.0
libtpu: 0.0.40
codegen_flags: <defaults>
</compile_context>

<pallas_src>
import functools

import jax
import jax.numpy as jnp
from jax import lax
from jax.experimental import pallas as pl
from jax.experimental.pallas import tpu as pltpu


def _round_up(x, m):
    return ((x + m - 1) // m) * m


# ----------------------------------------------------------------------------
# Pallas kernel: fused  (patches @ W) + bias -> activation, tiled over (M, N)
# ----------------------------------------------------------------------------
def _matmul_bias_act_kernel(x_ref, w_ref, b_ref, o_ref, *, activation):
    acc = jnp.dot(x_ref[...], w_ref[...], preferred_element_type=jnp.float32)
    acc = acc + b_ref[...]                       # (1, tn) f32, broadcasts over rows
    if activation == "relu":
        acc = jnp.maximum(acc, 0.0)
    elif activation == "sigmoid":
        acc = jax.nn.sigmoid(acc)
    o_ref[...] = acc.astype(o_ref.dtype)


def fused_matmul_bias_act(patches, w_mat, bias2d, activation, out_dtype):
    """patches: (M, K_p) bf16, w_mat: (K_p, N_p) bf16, bias2d: (1, N_p) f32.

    Returns (M, N_p) in `out_dtype`.  M is padded to a multiple of the row
    tile; K (reduction) is small (<= 9*Cin) and kept whole per tile, so bias
    and activation are applied directly (no K accumulator needed).
    """
    M, K_p = patches.shape
    K2, N_p = w_mat.shape
    assert K_p == K2 and bias2d.shape == (1, N_p)

    # ---- tile selection ------------------------------------------------------
    tm = min(512, _round_up(M, 8))               # rows per tile, multiple of 8
    M_p = _round_up(M, tm)
    if M_p != M:
        patches = jnp.pad(patches, ((0, M_p - M), (0, 0)))
    if N_p % 256 == 0:
        tn = 256                                 # 256-wide MXU tiles on v6e/v7x
    elif N_p >= 128:
        tn = 128
    else:
        tn = N_p                                 # full (only for tiny N)
    grid = (M_p // tm, N_p // tn)

    itemsize_out = jnp.dtype(out_dtype).itemsize
    cost = pl.CostEstimate(
        flops=2 * M_p * N_p * K_p,
        transcendentals=(M_p * N_p) if activation == "sigmoid" else 0,
        bytes_accessed=int(M_p * K_p * 2 + K_p * N_p * 2 + N_p * 4
                           + M_p * N_p * itemsize_out),
    )

    kernel = functools.partial(_matmul_bias_act_kernel, activation=activation)
    out = pl.pallas_call(
        kernel,
        out_shape=jax.ShapeDtypeStruct((M_p, N_p), out_dtype),
        grid=grid,
        in_specs=[
            pl.BlockSpec((tm, K_p), lambda i, j: (i, 0)),
            pl.BlockSpec((K_p, tn), lambda i, j: (0, j)),
            pl.BlockSpec((1, tn), lambda i, j: (0, j)),
        ],
        out_specs=pl.BlockSpec((tm, tn), lambda i, j: (i, j)),
        compiler_params=pltpu.CompilerParams(
            dimension_semantics=("parallel", "parallel")),
        cost_estimate=cost,
    )(patches, w_mat, bias2d)
    return out[:M] if M_p != M else out


# ----------------------------------------------------------------------------
# im2col glue (plain JAX, bf16) — NHWC
# ----------------------------------------------------------------------------
def _im2col_3x3_s2p1(x_nhwc, k_pad):
    """3x3 / stride 2 / pad 1 patches -> (B*Ho*Wo, k_pad) bf16."""
    B, H, W, C = x_nhwc.shape
    xb = x_nhwc.astype(jnp.bfloat16)
    xp = jnp.pad(xb, ((0, 0), (1, 1), (1, 1), (0, 0)))
    Ho = (H + 2 - 3) // 2 + 1
    Wo = (W + 2 - 3) // 2 + 1
    cols = []
    for i in range(3):
        for j in range(3):
            cols.append(xp[:, i:i + Ho * 2:2, j:j + Wo * 2:2, :])
    if k_pad > 9 * C:
        cols.append(jnp.zeros((B, Ho, Wo, k_pad - 9 * C), jnp.bfloat16))
    patches = jnp.concatenate(cols, axis=-1)
    return patches.reshape(B * Ho * Wo, k_pad), Ho, Wo


def _im2col_2x2_subpixel(x_nhwc, k_pad):
    """2x2 / stride 1 window over the bottom/right zero-padded input (sub-pixel
    ConvTranspose form) -> (B*H*W, k_pad) bf16."""
    B, H, W, C = x_nhwc.shape
    xb = x_nhwc.astype(jnp.bfloat16)
    xp = jnp.pad(xb, ((0, 0), (0, 1), (0, 1), (0, 0)))
    cols = [xp[:, di:di + H, dj:dj + W, :] for di in (0, 1) for dj in (0, 1)]
    if k_pad > 4 * C:
        cols.append(jnp.zeros((B, H, W, k_pad - 4 * C), jnp.bfloat16))
    patches = jnp.concatenate(cols, axis=-1)
    return patches.reshape(B * H * W, k_pad)


# ----------------------------------------------------------------------------
# One-time parameter preparation (layout plumbing hoisted out of the forward)
# ----------------------------------------------------------------------------
def _prep_conv(w_oihw, b):
    """Conv2d(k=3,s=2,p=1): weight -> (K_p, N_p) bf16 matmul form, padded bias."""
    Cout, Cin, kh, kw = w_oihw.shape
    K = kh * kw * Cin
    K_p = _round_up(K, 16)                       # bf16 sublane pack
    N_p = _round_up(Cout, 128)                   # lane-dense output
    w_mat = jnp.transpose(w_oihw, (2, 3, 1, 0)).reshape(K, Cout)
    w_mat = jnp.pad(w_mat, ((0, K_p - K), (0, N_p - Cout))).astype(jnp.bfloat16)
    bias = jnp.pad(b.astype(jnp.float32), (0, N_p - Cout)).reshape(1, N_p)
    return {"w": w_mat, "b": bias, "Cout": Cout, "K_p": K_p}


def _prep_convT(w_iohw, b):
    """ConvTranspose2d(k=3,s=2,p=1,op=1) as sub-pixel (4-phase) matmul weights.

    For output parity (r, c) and 2x2 window tap (di, dj) on the padded input,
    the contributing kernel tap is (kh, kw) = (1 + r - 2*di, 1 + c - 2*dj)
    when it lies inside the 3x3 kernel; all other entries are zero.
    """
    Cin, Cout, kh, kw = w_iohw.shape
    assert kh == 3 and kw == 3
    Cout_p = _round_up(Cout, 32)                 # 4 * Cout_p is a multiple of 128
    K = 4 * Cin
    K_p = _round_up(K, 16)
    N_p = 4 * Cout_p
    w_big = jnp.zeros((K_p, N_p), jnp.float32)
    for r in (0, 1):
        for c in (0, 1):
            p = 2 * r + c
            for di in (0, 1):
                for dj in (0, 1):
                    kh_i = 1 + r - 2 * di
                    kw_j = 1 + c - 2 * dj
                    if 0 <= kh_i <= 2 and 0 <= kw_j <= 2:
                        t = 2 * di + dj
                        w_big = w_big.at[
                            t * Cin:(t + 1) * Cin,
                            p * Cout_p:p * Cout_p + Cout].set(
                            w_iohw[:, :, kh_i, kw_j].astype(jnp.float32))
    bias = jnp.zeros((N_p,), jnp.float32)
    for p in range(4):
        bias = bias.at[p * Cout_p:p * Cout_p + Cout].set(b.astype(jnp.float32))
    return {"w": w_big.astype(jnp.bfloat16), "b": bias.reshape(1, N_p),
            "Cout": Cout, "Cout_p": Cout_p, "K_p": K_p}


def prepare_params(params):
    return {"enc": [_prep_conv(w, b) for (w, b) in params["enc"]],
            "dec": [_prep_convT(w, b) for (w, b) in params["dec"]]}


# ----------------------------------------------------------------------------
# Layers (NHWC internally)
# ----------------------------------------------------------------------------
def conv2d_s2p1(x_nhwc, prep, activation, out_dtype):
    B = x_nhwc.shape[0]
    patches, Ho, Wo = _im2col_3x3_s2p1(x_nhwc, prep["K_p"])
    out = fused_matmul_bias_act(patches, prep["w"], prep["b"], activation, out_dtype)
    out = out[:, :prep["Cout"]]
    return out.reshape(B, Ho, Wo, prep["Cout"])


def conv_transpose2d_s2p1op1(x_nhwc, prep, activation, out_dtype):
    B, H, W, _ = x_nhwc.shape
    patches = _im2col_2x2_subpixel(x_nhwc, prep["K_p"])
    out = fused_matmul_bias_act(patches, prep["w"], prep["b"], activation, out_dtype)
    Cout, Cout_p = prep["Cout"], prep["Cout_p"]
    out = out.reshape(B, H, W, 2, 2, Cout_p)[..., :Cout]      # (b, m, n, r, c, co)
    out = jnp.transpose(out, (0, 1, 3, 2, 4, 5)).reshape(B, 2 * H, 2 * W, Cout)
    return out


# ----------------------------------------------------------------------------
# Parameter init (deterministic, PyTorch-like uniform(-1/sqrt(fan_in), +))
# ----------------------------------------------------------------------------
def _init_conv(key, cout, cin, k):
    k1, k2 = jax.random.split(key)
    bound = 1.0 / jnp.sqrt(cin * k * k)
    w = jax.random.uniform(k1, (cout, cin, k, k), jnp.float32, -bound, bound)
    b = jax.random.uniform(k2, (cout,), jnp.float32, -bound, bound)
    return w, b


def _init_convT(key, cin, cout, k):
    k1, k2 = jax.random.split(key)
    bound = 1.0 / jnp.sqrt(cin * k * k)
    w = jax.random.uniform(k1, (cin, cout, k, k), jnp.float32, -bound, bound)
    b = jax.random.uniform(k2, (cout,), jnp.float32, -bound, bound)
    return w, b


def init_autoencoder_params(key, input_channels, output_channels, hidden_dims):
    params = {"enc": [], "dec": []}
    cin = input_channels
    for h in hidden_dims:
        key, sub = jax.random.split(key)
        params["enc"].append(_init_conv(sub, h, cin, 3))
        cin = h
    dims = hidden_dims[::-1]
    for i in range(len(dims) - 1):
        key, sub = jax.random.split(key)
        params["dec"].append(_init_convT(sub, dims[i], dims[i + 1], 3))
    key, sub = jax.random.split(key)
    params["dec"].append(_init_convT(sub, dims[-1], output_channels, 3))
    return params


# ----------------------------------------------------------------------------
# Autoencoder forward (NCHW in / NCHW out, NHWC + bf16 internally)
# ----------------------------------------------------------------------------
def autoencoder_forward(prepared, x_nchw):
    x = jnp.transpose(x_nchw, (0, 2, 3, 1)).astype(jnp.bfloat16)   # NCHW -> NHWC
    for prep in prepared["enc"]:                                   # Conv(s2) + ReLU
        x = conv2d_s2p1(x, prep, activation="relu", out_dtype=jnp.bfloat16)
    n_dec = len(prepared["dec"])
    for idx, prep in enumerate(prepared["dec"]):                   # ConvT(s2)+ReLU / Sigmoid
        last = idx == n_dec - 1
        x = conv_transpose2d_s2p1op1(
            x, prep,
            activation="sigmoid" if last else "relu",
            out_dtype=jnp.float32 if last else jnp.bfloat16)
    return jnp.transpose(x, (0, 3, 1, 2))                          # NHWC -> NCHW


# ----------------------------------------------------------------------------
# Pure-JAX f32 reference (for correctness check of the Pallas path)
# ----------------------------------------------------------------------------
def reference_forward(params, x_nchw):
    dn = ("NCHW", "OIHW", "NCHW")
    x = x_nchw
    for (w, b) in params["enc"]:
        x = lax.conv_general_dilated(x, w, (2, 2), ((1, 1), (1, 1)),
                                     dimension_numbers=dn)
        x = jnp.maximum(x + b[None, :, None, None], 0.0)
    n_dec = len(params["dec"])
    for idx, (w, b) in enumerate(params["dec"]):
        w_eq = jnp.transpose(w[:, :, ::-1, ::-1], (1, 0, 2, 3))    # (Cout, Cin, 3, 3)
        x = lax.conv_general_dilated(x, w_eq, (1, 1), ((1, 2), (1, 2)),
                                     lhs_dilation=(2, 2), dimension_numbers=dn)
        x = x + b[None, :, None, None]
        x = jax.nn.sigmoid(x) if idx == n_dec - 1 else jnp.maximum(x, 0.0)
    return x


if __name__ == "__main__":
    input_channels = 4
    output_channels = 4
    hidden_dims = [8, 16]
    B, H, W = 2, 16, 16

    key = jax.random.PRNGKey(0)
    kparam, kdata = jax.random.split(key)
    params = init_autoencoder_params(kparam, input_channels, output_channels, hidden_dims)
    prepared = prepare_params(params)
    x = jax.random.normal(kdata, (B, input_channels, H, W), jnp.float32)

    out = autoencoder_forward(prepared, x)
    out = jax.block_until_ready(out)
    assert out.shape == (B, output_channels, H, W), out.shape
    assert bool(jnp.all(jnp.isfinite(out)))

    # Correctness vs. pure-JAX f32 reference (bf16 matmul operands -> loose tol).
    ref = jax.block_until_ready(reference_forward(params, x))
    err = float(jnp.max(jnp.abs(out - ref)))
    assert err < 5e-2, f"max abs err vs reference: {err}"

    print("KERNEL_OK")
</pallas_src>

<mosaic_0001>
module attributes {stable_mosaic.version = 11 : i64} {
  func.func @_matmul_bias_act_kernel(%arg0: i32, %arg1: i32, %arg2: memref<128x48xbf16, #tpu.memory_space<vmem>>, %arg3: memref<48x128xbf16, #tpu.memory_space<vmem>>, %arg4: memref<1x128xf32, #tpu.memory_space<vmem>>, %arg5: memref<128x128xbf16, #tpu.memory_space<vmem>>) attributes {dimension_semantics = [#tpu.dimension_semantics<parallel>, #tpu.dimension_semantics<parallel>], iteration_bounds = array<i64: 1, 1>, scalar_prefetch = 0 : i64, scratch_operands = 0 : i64, tpu.core_type = #tpu.core_type<tc>, window_params = [{transform_indices = @transform_0, window_bounds = array<i64: 128, 48>}, {transform_indices = @transform_1, window_bounds = array<i64: 48, 128>}, {transform_indices = @transform_2, window_bounds = array<i64: 1, 128>}, {transform_indices = @transform_3, window_bounds = array<i64: 128, 128>}]} {
    %c0 = arith.constant 0 : index
    %c0_0 = arith.constant 0 : index
    %0 = vector.load %arg2[%c0, %c0_0] : memref<128x48xbf16, #tpu.memory_space<vmem>>, vector<128x48xbf16>
    %c0_1 = arith.constant 0 : index
    %c0_2 = arith.constant 0 : index
    %1 = vector.load %arg3[%c0_1, %c0_2] : memref<48x128xbf16, #tpu.memory_space<vmem>>, vector<48x128xbf16>
    %cst = arith.constant dense<0.000000e+00> : vector<128x128xf32>
    %2 = tpu.matmul %0, %1, %cst {dimension_numbers = #tpu.dot_dimension_numbers<[1], [0], [0], [1], [0, 0, 1, 1], [], []>} : vector<128x48xbf16>, vector<48x128xbf16>, vector<128x128xf32> -> vector<128x128xf32>
    %c0_3 = arith.constant 0 : index
    %c0_4 = arith.constant 0 : index
    %3 = vector.load %arg4[%c0_3, %c0_4] : memref<1x128xf32, #tpu.memory_space<vmem>>, vector<1x128xf32>
    %4 = vector.broadcast %3 : vector<1x128xf32> to vector<128x128xf32>
    %5 = arith.addf %2, %4 : vector<128x128xf32>
    %cst_5 = arith.constant 0.000000e+00 : f32
    %6 = vector.broadcast %cst_5 : f32 to vector<128x128xf32>
    %7 = arith.maximumf %5, %6 : vector<128x128xf32>
    %8 = arith.truncf %7 : vector<128x128xf32> to vector<128x128xbf16>
    %c0_6 = arith.constant 0 : index
    %c0_7 = arith.constant 0 : index
    %9 = vector.load %arg5[%c0_6, %c0_7] : memref<128x128xbf16, #tpu.memory_space<vmem>>, vector<128x128xbf16>
    tpu.vector_store %arg5[%c0_6, %c0_7], %8 {strides = array<i32>} : memref<128x128xbf16, #tpu.memory_space<vmem>>, vector<128x128xbf16>,
    return
  }
  func.func @transform_0(%arg0: i32, %arg1: i32) -> (i32, i32) {
    %c0_i32 = arith.constant 0 : i32
    %c0_i32_0 = arith.constant 0 : i32
    return %arg0, %c0_i32 : i32, i32
  }
  func.func @transform_1(%arg0: i32, %arg1: i32) -> (i32, i32) {
    %c0_i32 = arith.constant 0 : i32
    %c0_i32_0 = arith.constant 0 : i32
    return %c0_i32, %arg1 : i32, i32
  }
  func.func @transform_2(%arg0: i32, %arg1: i32) -> (i32, i32) {
    %c0_i32 = arith.constant 0 : i32
    %c0_i32_0 = arith.constant 0 : i32
    return %c0_i32, %arg1 : i32, i32
  }
  func.func @transform_3(%arg0: i32, %arg1: i32) -> (i32, i32) {
    %c0_i32 = arith.constant 0 : i32
    return %arg0, %arg1 : i32, i32
  }
}

</mosaic_0001>

<bundles_post_ra>
// kernel: tpu_custom_call.1
= control target key start
LH: loop header
LB: loop body
LE: loop exit
PB: predicated region body
PF: predicated region fallthrough
CT: control target
= control target key end

     0   :  { %vm103_vm0 = vcmask 392192   ;;  %s592_s0 = inlined_call_operand.vmem [shape: bf16[128,48], index: 0, kind: input, shape index: {}]   ;;  %s593_s1 = inlined_call_operand.vmem [shape: bf16[48,128], index: 1, kind: input, shape index: {}]   ;;  %s594_s2 = inlined_call_operand.vmem [shape: f32[1,128], index: 2, kind: input, shape index: {}]   ;;  %s595_s3 = inlined_call_operand.hbm [shape: bf16[128,128], index: 3, kind: output, shape index: {}]  }
   0x1   :  { %v478_v0 = vld [vmem:[%s593_s1] sm:$0xff]   ;;  %v479_v1 = vld [vmem:[%s593_s1 + $0x8] sm:$0xff]   ;;  %v480_v2 = vld [vmem:[%s593_s1 + $0x10] sm:$0xff]  }
   0x2   :  { %447 = vmatprep.subr.bf16.mxu0 %v478_v0  ;;  %469 = vmatprep.subr.bf16.mxu1 %v478_v0  ;;  %v481_v3 = vld [vmem:[%s592_s0] sm:$0xff]   ;;  %v483_v5 = vld [vmem:[%s592_s0 + $0x8] sm:$0xff]   ;;  %v485_v7 = vld [vmem:[%s592_s0 + $0x10] sm:$0xff]  }
   0x3   :  { %448 = vmatpush3.bf16.msra.mxu0 %v478_v0  ;;  %472 = vmatpush3.bf16.msra.mxu1 %v478_v0  ;;  %v482_v4 = vld [vmem:[%s592_s0 + $0x20] sm:$0xff]   ;;  %v484_v6 = vld [vmem:[%s592_s0 + $0x28] sm:$0xff]   ;;  %v486_v8 = vld [vmem:[%s592_s0 + $0x30] sm:$0xff]  }
   0x4   :  { %449 = vmatprep.subr.bf16.mxu0 %v479_v1  ;;  %470 = vmatprep.subr.bf16.mxu1 %v479_v1 }
   0x5   :  { %453 = vmatprep.mubr.msk.bf16.mxu0 %vm103_vm0, %v481_v3  ;;  %461 = vmatprep.mubr.msk.bf16.mxu1 %vm103_vm0, %v482_v4 }
   0x7   :  { %450 = vmatpush3.bf16.msra.mxu0 %v479_v1  ;;  %473 = vmatpush3.bf16.msra.mxu1 %v479_v1 }
   0x8   :  { %451 = vmatprep.subr.bf16.mxu0 %v480_v2  ;;  %471 = vmatprep.subr.bf16.mxu1 %v480_v2 }
   0xb   :  { %452 = vmatpush3.bf16.msra.mxu0 %v480_v2  ;;  %474 = vmatpush3.bf16.msra.mxu1 %v480_v2 }
   0xc   :  { %8 = vsyncpa [#allocation3], 0  ;;  %v487_v9 = vld [vmem:[%s592_s0 + $0x18] sm:$0xff]   ;;  %v337_v11 = vld [vmem:[%s594_s2] ss:$0 sm:$0xff] }
   0xd   :  { %v488_v10 = vld [vmem:[%s592_s0 + $0x38] sm:$0xff]   ;;  %s513_s0 = smov [#allocation2]  }
   0xe   :  { %454 = vmatmul.mubr.msk.bf16.vlgmr.msra.gmra.mrb[0].mxu0 %vm103_vm0, %v483_v5  ;;  %462 = vmatmul.mubr.msk.bf16.vlgmr.msra.gmra.mrb[0].mxu1 %vm103_vm0, %v484_v6  ;;  %s326_s2 = sshll.u32 %s513_s0, 4  ;;  %s327_s2 = int_to_ptr.vmem [resolvable:$true] %s326_s2 }
   0xf   :  { %457 = vmatprep.mubr.msk.bf16.mxu0 %vm103_vm0, %v485_v7  ;;  %465 = vmatprep.mubr.msk.bf16.mxu1 %vm103_vm0, %v486_v8  ;;  %s489_s8 = scalar_lea.vmem %s327_s2, 1024  ;;  %p494_p1 = scmp.lt.s32.totalorder %s327_s2, %s327_s2 }
  0x10   :  { %p490_p0 = scmp.ne.s32.totalorder %s327_s2, %s489_s8  ;;  %p495_p2 = scmp.lt.s32.totalorder %s489_s8, %s489_s8 }
  0x12   :  { %p496_p3 = por %p495_p2, %p494_p1 }
  0x14   :  { %p497_p4 = pnand %p496_p3, %p490_p0 }
  0x16   :  { %458 = vmatmul.mubr.msk.bf16.gmra.mrb[4].mxu0 %vm103_vm0, %v487_v9  ;;  %466 = vmatmul.mubr.msk.bf16.gmra.mrb[4].mxu1 %vm103_vm0, %v488_v10 }
  0xe1   :  { %v455_v12 = vpop.f32.mrb[0].mxu0  ;;  %v463_v13 = vpop.f32.mrb[0].mxu1 }
  0xe2   :  { %v171_v14 = vadd.f32 %v455_v12, %v337_v11  ;;  %v203_v15 = vadd.f32 %v463_v13, %v337_v11  ;;  %v162_v16 = vpop.f32.mrb[1].mxu0  ;;  %v194_v17 = vpop.f32.mrb[1].mxu1 }
  0xe3   :  { %v163_v18 = vadd.f32 %v337_v11, %v162_v16  ;;  %v195_v19 = vadd.f32 %v337_v11, %v194_v17  ;;  %v456_v20 = vpop.f32.mrb[2].mxu0  ;;  %v464_v21 = vpop.f32.mrb[2].mxu1 }
  0xe4   :  { %v174_v22 = vadd.f32 %v456_v20, %v337_v11  ;;  %v206_v23 = vadd.f32 %v464_v21, %v337_v11  ;;  %v165_v24 = vpop.f32.mrb[3].mxu0  ;;  %v197_v25 = vpop.f32.mrb[3].mxu1  ;;  %v227_v28 = vmax.f32 %v171_v14, 0.0  ;;  %v235_v29 = vmax.f32 %v203_v15, 0.0 }
  0xe5   :  { %v166_v26 = vadd.f32 %v337_v11, %v165_v24  ;;  %v198_v27 = vadd.f32 %v337_v11, %v197_v25  ;;  %v225_v32 = vmax.f32 %v163_v18, 0.0  ;;  %v233_v33 = vmax.f32 %v195_v19, 0.0 }
  0xe6   :  { %v228_v30 = vmax.f32 %v174_v22, 0.0  ;;  %v236_v31 = vmax.f32 %v206_v23, 0.0 }
  0xe7   :  { %v226_v34 = vmax.f32 %v166_v26, 0.0  ;;  %v234_v35 = vmax.f32 %v198_v27, 0.0 }
  0xe8   :  { %v397_v36 = vpack.c.bf16 %v228_v30, %v227_v28  ;;  %v417_v37 = vpack.c.bf16 %v236_v31, %v235_v29 }
  0xe9   :  { %v392_v38 = vpack.c.bf16 %v226_v34, %v225_v32  ;;  %v412_v39 = vpack.c.bf16 %v234_v35, %v233_v33  ;;  %v459_v40 = vpop.f32.mrb[4].mxu0  ;;  %v467_v41 = vpop.f32.mrb[4].mxu1 }
  0xea   :  { %429 = vst [vmem:[#allocation2 + $0x8] sm:$0xff] %v397_v36   ;;  %433 = vst [vmem:[#allocation2 + $0x28] sm:$0xff] %v417_v37   ;;  %v187_v42 = vadd.f32 %v459_v40, %v337_v11  ;;  %v219_v43 = vadd.f32 %v467_v41, %v337_v11  ;;  %v178_v44 = vpop.f32.mrb[5].mxu0  ;;  %v210_v45 = vpop.f32.mrb[5].mxu1 }
  0xeb   :  { %393 = vst [vmem:[#allocation2] sm:$0xff] %v392_v38   ;;  %432 = vst [vmem:[#allocation2 + $0x20] sm:$0xff] %v412_v39   ;;  %v179_v46 = vadd.f32 %v337_v11, %v178_v44  ;;  %v211_v47 = vadd.f32 %v337_v11, %v210_v45  ;;  %v460_v48 = vpop.f32.mrb[6].mxu0  ;;  %v468_v49 = vpop.f32.mrb[6].mxu1 }
  0xec   :  { %v190_v50 = vadd.f32 %v460_v48, %v337_v11  ;;  %v222_v51 = vadd.f32 %v468_v49, %v337_v11  ;;  %v181_v52 = vpop.f32.mrb[7].mxu0  ;;  %v213_v53 = vpop.f32.mrb[7].mxu1  ;;  %v231_v56 = vmax.f32 %v187_v42, 0.0  ;;  %v239_v57 = vmax.f32 %v219_v43, 0.0 }
  0xed   :  { %v182_v54 = vadd.f32 %v337_v11, %v181_v52  ;;  %v214_v55 = vadd.f32 %v337_v11, %v213_v53  ;;  %v229_v60 = vmax.f32 %v179_v46, 0.0  ;;  %v237_v61 = vmax.f32 %v211_v47, 0.0 }
  0xee   :  { %v232_v58 = vmax.f32 %v190_v50, 0.0  ;;  %v240_v59 = vmax.f32 %v222_v51, 0.0 }
  0xef   :  { %v230_v62 = vmax.f32 %v182_v54, 0.0  ;;  %v238_v63 = vmax.f32 %v214_v55, 0.0 }
  0xf0   :  { %v407_v0 = vpack.c.bf16 %v232_v58, %v231_v56  ;;  %v427_v1 = vpack.c.bf16 %v240_v59, %v239_v57 }
  0xf1   :  { %v402_v2 = vpack.c.bf16 %v230_v62, %v229_v60  ;;  %v422_v3 = vpack.c.bf16 %v238_v63, %v237_v61 }
  0xf2   :  { %431 = vst [vmem:[#allocation2 + $0x18] sm:$0xff] %v407_v0   ;;  %435 = vst [vmem:[#allocation2 + $0x38] sm:$0xff] %v427_v1  }
  0xf3   :  { %430 = vst [vmem:[#allocation2 + $0x10] sm:$0xff] %v402_v2   ;;  %434 = vst [vmem:[#allocation2 + $0x30] sm:$0xff] %v422_v3  }
  0xf4   :  { %500 = shalt.err (!%p497_p4)
}
  0xf5   :  { %s501_s11 = scalar_lea.hbm %s595_s3, 1024 }
  0xf6   :  { %p502_p5 = scmp.ne.s32.totalorder %s595_s3, %s501_s11  ;;  %p505_p6 = scmp.lt.u32.totalorder %s501_s11, %s595_s3 }
  0xf8   :  { %p507_p7 = pnand %p505_p6, %p502_p5 }
  0xfa   :  { %510 = shalt.err (!%p507_p7)
}
  0xfb   :  { %s514_s16 = smov 64   ;;  %s515_s17 = smov 4  }
  0xfc   :  { %332 = dma.vmem_to_hbm [thread:$0]  %s327_s2, 1024, %s595_s3, [#allocation3], %s514_s16, %s514_s16, %s515_s17  }
  0xfd   :  { %511 = dma.done.wait [#allocation3], 1024  }
  0xfe   :  { %512 = vsyncadd [#allocation3], 4294966272 }
  0xff   :  { %336 = vsyncpa [#allocation3], 1 }

</bundles_post_ra>
